<compile_context>
chip_gen: v5e
topology: v5e:2x2
jax: 0.10.0
libtpu: 0.0.40
codegen_flags: <defaults>
</compile_context>

<pallas_src>
import functools

import jax
import jax.numpy as jnp
from jax.experimental import pallas as pl
from jax.experimental.pallas import tpu as pltpu

LANE = 128     # lane width: feature dims padded to a multiple of this
SUBLANE = 8    # sublane width: batch padded to a multiple of this


def _round_up(x, m):
    return ((x + m - 1) // m) * m


def _fused_mlp_kernel(x_ref, w_ref, b_ref, o_ref, *, n_tanh_layers):
    """Whole MLP in one kernel.

    x_ref: [Bp, F]  f32   padded input activations
    w_ref: [L, F, F] bf16 stacked, zero-padded weights (layer-major)
    b_ref: [L, 1, F] f32  stacked, zero-padded biases
    o_ref: [Bp, F]  f32   padded output (valid data in the first `out` lanes)
    """
    h = x_ref[...]  # [Bp, F] f32 -- small enough to live entirely in vregs

    # (Linear -> Tanh) for fc1 .. fc_{n_hidden+1}; static loop => static views.
    for l in range(n_tanh_layers):
        y = jnp.dot(h.astype(jnp.bfloat16), w_ref[l],
                    preferred_element_type=jnp.float32)
        h = jnp.tanh(y + b_ref[l])

    # fc_last -> Sigmoid (exp + approx reciprocal both land on the EUP slot).
    y = jnp.dot(h.astype(jnp.bfloat16), w_ref[n_tanh_layers],
                preferred_element_type=jnp.float32)
    y = y + b_ref[n_tanh_layers]
    o_ref[...] = pl.reciprocal(1.0 + jnp.exp(-y), approx=True)


def pack_mlp_params(params):
    """One-time packing: stack + zero-pad weights (bf16) and biases (f32).

    params: list of (w: [in, out] f32, b: [1, out] f32).
    Returns (w_stack [L,F,F] bf16, b_stack [L,1,F] f32, meta dict).
    """
    L = len(params)
    in_features = params[0][0].shape[0]
    out_features = params[-1][0].shape[1]
    dims = [in_features] + [w.shape[1] for w, _ in params]
    F = _round_up(max(dims), LANE)

    w_stack = jnp.zeros((L, F, F), jnp.bfloat16)
    b_stack = jnp.zeros((L, 1, F), jnp.float32)
    for l, (w, b) in enumerate(params):
        fi, fo = w.shape
        w_stack = w_stack.at[l, :fi, :fo].set(w.astype(jnp.bfloat16))
        b_stack = b_stack.at[l, :, :fo].set(b.astype(jnp.float32))

    meta = dict(n_layers=L, feat=F,
                in_features=in_features, out_features=out_features)
    return w_stack, b_stack, meta


@functools.partial(
    jax.jit,
    static_argnames=("n_layers", "feat", "in_features", "out_features"))
def _mlp_forward_impl(x, w_stack, b_stack, *, n_layers, feat,
                      in_features, out_features):
    B = x.shape[0]
    F = feat
    Bp = _round_up(B, SUBLANE)

    # Pad input to [Bp, F]; fuses with the pallas_call under jit.
    x_p = jnp.zeros((Bp, F), jnp.float32).at[:B, :in_features].set(
        x.astype(jnp.float32))

    kernel = functools.partial(_fused_mlp_kernel, n_tanh_layers=n_layers - 1)
    out_p = pl.pallas_call(
        kernel,
        out_shape=jax.ShapeDtypeStruct((Bp, F), jnp.float32),
        grid=(1,),
        in_specs=[
            pl.BlockSpec((Bp, F), lambda i: (0, 0)),
            pl.BlockSpec((n_layers, F, F), lambda i: (0, 0, 0)),
            pl.BlockSpec((n_layers, 1, F), lambda i: (0, 0, 0)),
        ],
        out_specs=pl.BlockSpec((Bp, F), lambda i: (0, 0)),
        compiler_params=pltpu.CompilerParams(
            dimension_semantics=("arbitrary",)),
    )(x_p, w_stack, b_stack)
    # TODO(synk): when B grows beyond a few hundred rows, tile the batch axis
    # (grid=(pl.cdiv(Bp, 256),), activation specs indexed by i, weight specs
    # returning (0,0,0), dimension_semantics=("parallel",)) to use v7x's 2nd TC
    # and overlap activation DMA with compute; keep grid=(1,) at this size.
    return out_p[:B, :out_features]


def mlp_forward(x, w_stack, b_stack, meta):
    """Fused MLP forward. Pack params once with pack_mlp_params(), reuse here."""
    return _mlp_forward_impl(x, w_stack, b_stack, **meta)


def init_mlp_params(key, input_size, hidden_size, n_hidden, output_size, b_scale):
    """Deterministic init matching MLP.reinitialize():
    kaiming_normal_ (fan_in, gain=sqrt(2)) on weights, normal(0, b_scale) on
    biases. Weights stored transposed as [in, out]."""
    dims = [input_size] + [hidden_size] * (n_hidden + 1) + [output_size]
    params = []
    for fan_in, fan_out in zip(dims[:-1], dims[1:]):
        key, kw, kb = jax.random.split(key, 3)
        std = jnp.sqrt(2.0 / fan_in)  # kaiming_normal_ default => sqrt(2/fan_in)
        w = std * jax.random.normal(kw, (fan_in, fan_out), dtype=jnp.float32)
        b = b_scale * jax.random.normal(kb, (1, fan_out), dtype=jnp.float32)
        params.append((w, b))
    return params


def _mlp_reference(x, params, mxu_dtype=jnp.float32):
    """Pure-JAX reference of MLP.forward. mxu_dtype=bfloat16 mirrors the
    kernel's bf16 MXU operands (f32 accumulation + f32 elementwise)."""
    h = x.astype(jnp.float32)
    for w, b in params[:-1]:
        y = jnp.dot(h.astype(mxu_dtype), w.astype(mxu_dtype),
                    preferred_element_type=jnp.float32) + b
        h = jnp.tanh(y)
    w, b = params[-1]
    y = jnp.dot(h.astype(mxu_dtype), w.astype(mxu_dtype),
                preferred_element_type=jnp.float32) + b
    return jax.nn.sigmoid(y)


if __name__ == "__main__":
    # Small shapes consistent with the module's forward.
    batch = 8
    input_size = 16
    hidden_size = 32
    n_hidden = 2
    output_size = 4
    w_scale = 1.0   # stored by the PyTorch module but unused in forward/init
    b_scale = 0.1

    key = jax.random.PRNGKey(0)
    key, kx = jax.random.split(key)
    x = jax.random.normal(kx, (batch, input_size), dtype=jnp.float32)

    params = init_mlp_params(
        key, input_size, hidden_size, n_hidden, output_size, b_scale)

    # Pack weights/biases ONCE (hoisted out of the per-call path).
    w_stack, b_stack, meta = pack_mlp_params(params)

    out = mlp_forward(x, w_stack, b_stack, meta)
    out = jax.block_until_ready(out)
    assert out.shape == (batch, output_size)

    # Correctness:
    #  * tight check vs a reference that matches the kernel's bf16 MXU operands
    #    (residual error is the approx-reciprocal sigmoid, ~1e-3),
    #  * loose check vs the full-f32 reference (bf16 weight quantization).
    ref_bf16 = _mlp_reference(x, params, mxu_dtype=jnp.bfloat16)
    ref_f32 = _mlp_reference(x, params, mxu_dtype=jnp.float32)
    assert bool(jnp.allclose(out, ref_bf16, atol=5e-3, rtol=5e-3))
    assert bool(jnp.allclose(out, ref_f32, atol=2e-2, rtol=2e-2))

    print("KERNEL_OK")
</pallas_src>

<mosaic_0001>
module attributes {stable_mosaic.version = 11 : i64} {
  func.func @_fused_mlp_kernel(%arg0: i32, %arg1: memref<8x128xf32, #tpu.memory_space<vmem>>, %arg2: memref<4x128x128xbf16, #tpu.memory_space<vmem>>, %arg3: memref<4x1x128xf32, #tpu.memory_space<vmem>>, %arg4: memref<8x128xf32, #tpu.memory_space<vmem>>) attributes {dimension_semantics = [#tpu.dimension_semantics<arbitrary>], iteration_bounds = array<i64: 1>, scalar_prefetch = 0 : i64, scratch_operands = 0 : i64, tpu.core_type = #tpu.core_type<tc>, window_params = [{pipeline_mode = #tpu.pipeline_mode<synchronous>, transform_indices = @transform_0, window_bounds = array<i64: 8, 128>}, {pipeline_mode = #tpu.pipeline_mode<synchronous>, transform_indices = @transform_1, window_bounds = array<i64: 4, 128, 128>}, {pipeline_mode = #tpu.pipeline_mode<synchronous>, transform_indices = @transform_2, window_bounds = array<i64: 4, 1, 128>}, {pipeline_mode = #tpu.pipeline_mode<synchronous>, transform_indices = @transform_3, window_bounds = array<i64: 8, 128>}]} {
    %c0 = arith.constant 0 : index
    %c0_0 = arith.constant 0 : index
    %0 = vector.load %arg1[%c0, %c0_0] : memref<8x128xf32, #tpu.memory_space<vmem>>, vector<8x128xf32>
    %1 = arith.truncf %0 : vector<8x128xf32> to vector<8x128xbf16>
    %c0_1 = arith.constant 0 : index
    %c0_2 = arith.constant 0 : index
    %c0_3 = arith.constant 0 : index
    %2 = vector.load %arg2[%c0_1, %c0_2, %c0_3] : memref<4x128x128xbf16, #tpu.memory_space<vmem>>, vector<1x128x128xbf16>
    %3 = vector.shape_cast %2 : vector<1x128x128xbf16> to vector<128x128xbf16>
    %cst = arith.constant dense<0.000000e+00> : vector<8x128xf32>
    %4 = tpu.matmul %1, %3, %cst {dimension_numbers = #tpu.dot_dimension_numbers<[1], [0], [0], [1], [0, 0, 1, 1], [], []>} : vector<8x128xbf16>, vector<128x128xbf16>, vector<8x128xf32> -> vector<8x128xf32>
    %c0_4 = arith.constant 0 : index
    %c0_5 = arith.constant 0 : index
    %c0_6 = arith.constant 0 : index
    %5 = vector.load %arg3[%c0_4, %c0_5, %c0_6] : memref<4x1x128xf32, #tpu.memory_space<vmem>>, vector<1x1x128xf32>
    %6 = vector.shape_cast %5 : vector<1x1x128xf32> to vector<1x128xf32>
    %7 = vector.broadcast %6 : vector<1x128xf32> to vector<8x128xf32>
    %8 = arith.addf %4, %7 : vector<8x128xf32>
    %9 = math.tanh %8 : vector<8x128xf32>
    %10 = arith.truncf %9 : vector<8x128xf32> to vector<8x128xbf16>
    %c1 = arith.constant 1 : index
    %c0_7 = arith.constant 0 : index
    %c0_8 = arith.constant 0 : index
    %11 = vector.load %arg2[%c1, %c0_7, %c0_8] : memref<4x128x128xbf16, #tpu.memory_space<vmem>>, vector<1x128x128xbf16>
    %12 = vector.shape_cast %11 : vector<1x128x128xbf16> to vector<128x128xbf16>
    %cst_9 = arith.constant dense<0.000000e+00> : vector<8x128xf32>
    %13 = tpu.matmul %10, %12, %cst_9 {dimension_numbers = #tpu.dot_dimension_numbers<[1], [0], [0], [1], [0, 0, 1, 1], [], []>} : vector<8x128xbf16>, vector<128x128xbf16>, vector<8x128xf32> -> vector<8x128xf32>
    %c1_10 = arith.constant 1 : index
    %c0_11 = arith.constant 0 : index
    %c0_12 = arith.constant 0 : index
    %14 = vector.load %arg3[%c1_10, %c0_11, %c0_12] : memref<4x1x128xf32, #tpu.memory_space<vmem>>, vector<1x1x128xf32>
    %15 = vector.shape_cast %14 : vector<1x1x128xf32> to vector<1x128xf32>
    %16 = vector.broadcast %15 : vector<1x128xf32> to vector<8x128xf32>
    %17 = arith.addf %13, %16 : vector<8x128xf32>
    %18 = math.tanh %17 : vector<8x128xf32>
    %19 = arith.truncf %18 : vector<8x128xf32> to vector<8x128xbf16>
    %c2 = arith.constant 2 : index
    %c0_13 = arith.constant 0 : index
    %c0_14 = arith.constant 0 : index
    %20 = vector.load %arg2[%c2, %c0_13, %c0_14] : memref<4x128x128xbf16, #tpu.memory_space<vmem>>, vector<1x128x128xbf16>
    %21 = vector.shape_cast %20 : vector<1x128x128xbf16> to vector<128x128xbf16>
    %cst_15 = arith.constant dense<0.000000e+00> : vector<8x128xf32>
    %22 = tpu.matmul %19, %21, %cst_15 {dimension_numbers = #tpu.dot_dimension_numbers<[1], [0], [0], [1], [0, 0, 1, 1], [], []>} : vector<8x128xbf16>, vector<128x128xbf16>, vector<8x128xf32> -> vector<8x128xf32>
    %c2_16 = arith.constant 2 : index
    %c0_17 = arith.constant 0 : index
    %c0_18 = arith.constant 0 : index
    %23 = vector.load %arg3[%c2_16, %c0_17, %c0_18] : memref<4x1x128xf32, #tpu.memory_space<vmem>>, vector<1x1x128xf32>
    %24 = vector.shape_cast %23 : vector<1x1x128xf32> to vector<1x128xf32>
    %25 = vector.broadcast %24 : vector<1x128xf32> to vector<8x128xf32>
    %26 = arith.addf %22, %25 : vector<8x128xf32>
    %27 = math.tanh %26 : vector<8x128xf32>
    %28 = arith.truncf %27 : vector<8x128xf32> to vector<8x128xbf16>
    %c3 = arith.constant 3 : index
    %c0_19 = arith.constant 0 : index
    %c0_20 = arith.constant 0 : index
    %29 = vector.load %arg2[%c3, %c0_19, %c0_20] : memref<4x128x128xbf16, #tpu.memory_space<vmem>>, vector<1x128x128xbf16>
    %30 = vector.shape_cast %29 : vector<1x128x128xbf16> to vector<128x128xbf16>
    %cst_21 = arith.constant dense<0.000000e+00> : vector<8x128xf32>
    %31 = tpu.matmul %28, %30, %cst_21 {dimension_numbers = #tpu.dot_dimension_numbers<[1], [0], [0], [1], [0, 0, 1, 1], [], []>} : vector<8x128xbf16>, vector<128x128xbf16>, vector<8x128xf32> -> vector<8x128xf32>
    %c3_22 = arith.constant 3 : index
    %c0_23 = arith.constant 0 : index
    %c0_24 = arith.constant 0 : index
    %32 = vector.load %arg3[%c3_22, %c0_23, %c0_24] : memref<4x1x128xf32, #tpu.memory_space<vmem>>, vector<1x1x128xf32>
    %33 = vector.shape_cast %32 : vector<1x1x128xf32> to vector<1x128xf32>
    %34 = vector.broadcast %33 : vector<1x128xf32> to vector<8x128xf32>
    %35 = arith.addf %31, %34 : vector<8x128xf32>
    %cst_25 = arith.constant 0.000000e+00 : f32
    %36 = vector.broadcast %cst_25 : f32 to vector<8x128xf32>
    %37 = arith.subf %36, %35 : vector<8x128xf32>
    %38 = math.exp %37 : vector<8x128xf32>
    %cst_26 = arith.constant 1.000000e+00 : f32
    %39 = vector.broadcast %cst_26 : f32 to vector<8x128xf32>
    %40 = arith.addf %39, %38 : vector<8x128xf32>
    %41 = tpu.reciprocal %40 {approx = true} : vector<8x128xf32> -> vector<8x128xf32>
    %c0_27 = arith.constant 0 : index
    %c0_28 = arith.constant 0 : index
    %42 = vector.load %arg4[%c0_27, %c0_28] : memref<8x128xf32, #tpu.memory_space<vmem>>, vector<8x128xf32>
    tpu.vector_store %arg4[%c0_27, %c0_28], %41 {strides = array<i32>} : memref<8x128xf32, #tpu.memory_space<vmem>>, vector<8x128xf32>,
    return
  }
  func.func @transform_0(%arg0: i32) -> (i32, i32) {
    %c0_i32 = arith.constant 0 : i32
    %c0_i32_0 = arith.constant 0 : i32
    %c0_i32_1 = arith.constant 0 : i32
    return %c0_i32, %c0_i32_0 : i32, i32
  }
  func.func @transform_1(%arg0: i32) -> (i32, i32, i32) {
    %c0_i32 = arith.constant 0 : i32
    %c0_i32_0 = arith.constant 0 : i32
    %c0_i32_1 = arith.constant 0 : i32
    %c0_i32_2 = arith.constant 0 : i32
    return %c0_i32, %c0_i32_0, %c0_i32_1 : i32, i32, i32
  }
  func.func @transform_2(%arg0: i32) -> (i32, i32, i32) {
    %c0_i32 = arith.constant 0 : i32
    %c0_i32_0 = arith.constant 0 : i32
    %c0_i32_1 = arith.constant 0 : i32
    %c0_i32_2 = arith.constant 0 : i32
    return %c0_i32, %c0_i32_0, %c0_i32_1 : i32, i32, i32
  }
  func.func @transform_3(%arg0: i32) -> (i32, i32) {
    %c0_i32 = arith.constant 0 : i32
    %c0_i32_0 = arith.constant 0 : i32
    %c0_i32_1 = arith.constant 0 : i32
    return %c0_i32, %c0_i32_0 : i32, i32
  }
}

</mosaic_0001>

<bundles_post_ra>
// kernel: _mlp_forward_impl.1
= control target key start
LH: loop header
LB: loop body
LE: loop exit
PB: predicated region body
PF: predicated region fallthrough
CT: control target
= control target key end

     0   :  { %8 = vsyncpa [#allocation3], 0  ;;  %s585_s15 = smov [#allocation2]   ;;  %s586_s17 = smov 64   ;;  %s629_s0 = inlined_call_operand.vmem [shape: f32[8,128], index: 0, kind: input, shape index: {}]   ;;  %s630_s1 = inlined_call_operand.hbm [shape: bf16[4,128,128], index: 1, kind: input, shape index: {}]   ;;  %s631_s2 = inlined_call_operand.vmem [shape: f32[4,1,128], index: 2, kind: input, shape index: {}]   ;;  %s632_s3 = inlined_call_operand.vmem [shape: f32[8,128], index: 3, kind: output, shape index: {}]  }
   0x1   :  { %s15_s14 = sshll.u32 %s630_s1, 4  ;;  %s17_s16 = sshll.u32 %s585_s15, 4  ;;  %s16_s14 = int_to_ptr.hbm [resolvable:$true] %s15_s14  ;;  %s18_s16 = int_to_ptr.vmem [resolvable:$true] %s17_s16 }
   0x2   :  { %s587_s18 = smov 4  }
   0x3   :  { %23 = dma.hbm_to_vmem [thread:$0]  %s16_s14, 4096, %s18_s16, [#allocation3], %s586_s17, %s586_s17, %s587_s18  }
   0x4   :  { %583 = dma.done.wait [#allocation3], 4096  }
   0x5   :  { %584 = vsyncadd [#allocation3], 4294963200  ;;  %v517_v0 = vld [vmem:[#allocation2 + $0x38] sm:$0xff]  ;;  %v516_v1 = vld [vmem:[#allocation2 + $0x30] sm:$0xff] }
   0x6   :  { %100 = vmatpush.bf16.msra.mxu0 %v517_v0  ;;  %v525_v2 = vld [vmem:[#allocation2 + $0x78] sm:$0xff]  ;;  %v524_v3 = vld [vmem:[#allocation2 + $0x70] sm:$0xff]  ;;  %v515_v4 = vld [vmem:[#allocation2 + $0x28] sm:$0xff] }
   0x7   :  { %185 = vmatpush.bf16.msra.mxu1 %v525_v2  ;;  %v523_v5 = vld [vmem:[#allocation2 + $0x68] sm:$0xff]  ;;  %v514_v6 = vld [vmem:[#allocation2 + $0x20] sm:$0xff]  ;;  %v513_v8 = vld [vmem:[#allocation2 + $0x18] sm:$0xff] }
   0x8   :  { %v522_v7 = vld [vmem:[#allocation2 + $0x60] sm:$0xff]  ;;  %v521_v9 = vld [vmem:[#allocation2 + $0x58] sm:$0xff]  ;;  %v512_v10 = vld [vmem:[#allocation2 + $0x10] sm:$0xff] }
   0x9   :  { %v511_v11 = vld [vmem:[#allocation2 + $0x8] sm:$0xff]  ;;  %v510_v12 = vld [vmem:[#allocation2] sm:$0xff]  ;;  %v520_v15 = vld [vmem:[#allocation2 + $0x50] sm:$0xff] }
   0xa   :  { %101 = vmatpush.bf16.msra.mxu0 %v516_v1  ;;  %v30_v13 = vld [vmem:[%s629_s0] sm:$0xff]  ;;  %v519_v16 = vld [vmem:[#allocation2 + $0x48] sm:$0xff]  ;;  %v533_v18 = vld [vmem:[#allocation2 + $0xb8] sm:$0xff] }
   0xb   :  { %186 = vmatpush.bf16.msra.mxu1 %v524_v3  ;;  %v31_v14 = vpack.c.bf16 %v30_v13, %v30_v13  ;;  %v518_v17 = vld [vmem:[#allocation2 + $0x40] sm:$0xff]  ;;  %270 = vmatpush.bf16.msra.mxu2 %v533_v18  ;;  %v532_v19 = vld [vmem:[#allocation2 + $0xb0] sm:$0xff]  ;;  %v531_v20 = vld [vmem:[#allocation2 + $0xa8] sm:$0xff] }
   0xc   :  { %v530_v21 = vld [vmem:[#allocation2 + $0xa0] sm:$0xff]  ;;  %v529_v22 = vld [vmem:[#allocation2 + $0x98] sm:$0xff]  ;;  %v528_v29 = vld [vmem:[#allocation2 + $0x90] sm:$0xff] }
   0xd   :  { %v545_v23 = vld [vmem:[%s631_s2] ss:$0 sm:$0xff]  ;;  %v527_v30 = vld [vmem:[#allocation2 + $0x88] sm:$0xff]  ;;  %v541_v32 = vld [vmem:[#allocation2 + $0xf8] sm:$0xff] }
   0xe   :  { %102 = vmatpush.bf16.msra.mxu0 %v515_v4  ;;  %v526_v31 = vld [vmem:[#allocation2 + $0x80] sm:$0xff]  ;;  %355 = vmatpush.bf16.msra.mxu3 %v541_v32  ;;  %v540_v33 = vld [vmem:[#allocation2 + $0xf0] sm:$0xff]  ;;  %v539_v34 = vld [vmem:[#allocation2 + $0xe8] sm:$0xff] }
   0xf   :  { %187 = vmatpush.bf16.msra.mxu1 %v523_v5  ;;  %271 = vmatpush.bf16.msra.mxu2 %v532_v19  ;;  %v538_v35 = vld [vmem:[#allocation2 + $0xe0] sm:$0xff]  ;;  %v537_v36 = vld [vmem:[#allocation2 + $0xd8] sm:$0xff]  ;;  %v536_v43 = vld [vmem:[#allocation2 + $0xd0] sm:$0xff] }
  0x10   :  { %v546_v37 = vld [vmem:[%s631_s2 + $0x1] ss:$0 sm:$0xff]  ;;  %v535_v44 = vld [vmem:[#allocation2 + $0xc8] sm:$0xff]  ;;  %v547_v46 = vld [vmem:[%s631_s2 + $0x2] ss:$0 sm:$0xff] }
  0x11   :  { %v534_v45 = vld [vmem:[#allocation2 + $0xc0] sm:$0xff] }
  0x12   :  { %103 = vmatpush.bf16.msra.mxu0 %v514_v6  ;;  %356 = vmatpush.bf16.msra.mxu3 %v540_v33  ;;  %v548_v52 = vld [vmem:[%s631_s2 + $0x3] ss:$0 sm:$0xff] }
  0x13   :  { %188 = vmatpush.bf16.msra.mxu1 %v522_v7  ;;  %272 = vmatpush.bf16.msra.mxu2 %v531_v20 }
  0x16   :  { %104 = vmatpush.bf16.msra.mxu0 %v513_v8  ;;  %357 = vmatpush.bf16.msra.mxu3 %v539_v34 }
  0x17   :  { %189 = vmatpush.bf16.msra.mxu1 %v521_v9  ;;  %273 = vmatpush.bf16.msra.mxu2 %v530_v21 }
  0x1a   :  { %105 = vmatpush.bf16.msra.mxu0 %v512_v10  ;;  %358 = vmatpush.bf16.msra.mxu3 %v538_v35 }
  0x1b   :  { %190 = vmatpush.bf16.msra.mxu1 %v520_v15  ;;  %274 = vmatpush.bf16.msra.mxu2 %v529_v22 }
  0x1e   :  { %106 = vmatpush.bf16.msra.mxu0 %v511_v11  ;;  %359 = vmatpush.bf16.msra.mxu3 %v537_v36 }
  0x1f   :  { %191 = vmatpush.bf16.msra.mxu1 %v519_v16  ;;  %275 = vmatpush.bf16.msra.mxu2 %v528_v29 }
  0x22   :  { %107 = vmatpush.bf16.msra.mxu0 %v510_v12  ;;  %360 = vmatpush.bf16.msra.mxu3 %v536_v43 }
  0x23   :  { %192 = vmatpush.bf16.msra.mxu1 %v518_v17  ;;  %276 = vmatpush.bf16.msra.mxu2 %v527_v30 }
  0x25   :  { %108 = vmatmul.bf16.vlgmr.msra.gmra.mxu0 %v31_v14 }
  0x26   :  { %361 = vmatpush.bf16.msra.mxu3 %v535_v44 }
  0x27   :  { %277 = vmatpush.bf16.msra.mxu2 %v526_v31 }
  0x2a   :  { %362 = vmatpush.bf16.msra.mxu3 %v534_v45 }
  0xa2   :  { %v109_v24 = vpop.f32.mrf.mxu0 }
  0xa3   :  { %v110_v25 = vadd.f32 %v545_v23, %v109_v24 }
  0xa5   :  { %549 = vtanh.f32 %v110_v25 }
  0xaa   :  { %v111_v26 = vpop.f32.mrf.mxu0 }
  0xab   :  { %v550_v27 = vpop.eup %549 }
  0xac   :  { %v114_v28 = vpack.c.bf16 %v550_v27, %v550_v27 }
  0xae   :  { %193 = vmatmul.bf16.vlgmr.msra.gmra.mxu1 %v114_v28 }
 0x12b   :  { %v194_v38 = vpop.f32.mrf.mxu1 }
 0x12c   :  { %v195_v39 = vadd.f32 %v546_v37, %v194_v38 }
 0x12e   :  { %551 = vtanh.f32 %v195_v39 }
 0x133   :  { %v196_v40 = vpop.f32.mrf.mxu1 }
 0x134   :  { %v552_v41 = vpop.eup %551 }
 0x135   :  { %v199_v42 = vpack.c.bf16 %v552_v41, %v552_v41 }
 0x137   :  { %278 = vmatmul.bf16.vlgmr.msra.gmra.mxu2 %v199_v42 }
 0x1ba   :  { %v279_v47 = vpop.f32.mrf.mxu2 }
 0x1bb   :  { %v280_v48 = vadd.f32 %v547_v46, %v279_v47 }
 0x1bd   :  { %553 = vtanh.f32 %v280_v48 }
 0x1c2   :  { %v281_v49 = vpop.f32.mrf.mxu2 }
 0x1c3   :  { %v554_v50 = vpop.eup %553 }
 0x1c4   :  { %v284_v51 = vpack.c.bf16 %v554_v50, %v554_v50 }
 0x1c6   :  { %363 = vmatmul.bf16.vlgmr.msra.gmra.mxu3 %v284_v51 }
 0x249   :  { %v364_v53 = vpop.f32.mrf.mxu3 }
 0x24a   :  { %v365_v54 = vadd.f32 %v548_v52, %v364_v53 }
 0x24c   :  { %v368_v55 = vsub.f32 0.0, %v365_v54 }
 0x24e   :  { %v369_v56 = vmul.f32 1.442695, %v368_v55 }
 0x250   :  { %555 = vpow2.f32 %v369_v56 }
 0x251   :  { %v366_v57 = vpop.f32.mrf.mxu3 }
 0x256   :  { %v556_v58 = vpop.eup %555 }
 0x257   :  { %v371_v59 = vadd.f32 1.0, %v556_v58 }
 0x259   :  { %557 = vrcp.f32 %v371_v59 }
 0x25f   :  { %v558_v60 = vpop.eup %557 }
 0x260   :  { %373 = vst [vmem:[%s632_s3] sm:$0xff] %v558_v60 }
 0x261   :  { %378 = vsyncpa [#allocation3], 1 }

</bundles_post_ra>
